<compile_context>
chip_gen: v7x
topology: tpu7x:2x2x1
jax: 0.10.0
libtpu: 0.0.40
codegen_flags: <defaults>
</compile_context>

<pallas_src>
import functools
import math

import jax
import jax.numpy as jnp
import numpy as np
from jax.experimental import pallas as pl
from jax.experimental.pallas import tpu as pltpu


def _pe_add_kernel(x_ref, pe_ref, o_ref):
    # Blocks: x_ref / o_ref are (TR, W) (batch dim squeezed), pe_ref is (TR, W) f32.
    o_ref[...] = (x_ref[...].astype(jnp.float32) + pe_ref[...]).astype(o_ref.dtype)


@functools.lru_cache(maxsize=None)
def _pe_table(seq_len: int, d_model: int) -> jax.Array:
    """Constant [seq_len, d_model] f32 sin/cos table (what PyTorch writes into pe[0]).

    Built once on the host and cached across calls (keyed on (S, d_model))."""
    assert d_model % 2 == 0, "d_model must be even (matches PyTorch 0::2 / 1::2 slicing)"
    position = np.arange(seq_len, dtype=np.float32)[:, None]                     # [S, 1]
    div_term = np.exp(np.arange(0, d_model, 2, dtype=np.float32)
                      * (-math.log(10000.0) / d_model))                          # [D/2]
    angles = position * div_term                                                 # [S, D/2]
    pe = np.zeros((seq_len, d_model), dtype=np.float32)
    pe[:, 0::2] = np.sin(angles)
    pe[:, 1::2] = np.cos(angles)
    return jnp.asarray(pe)  # device-resident constant, reused across calls


def _choose_rows_tile(rows: int, width: int, itemsize: int) -> int:
    """Row-tile from a VMEM byte budget; multiple of the dtype's sublane packing."""
    packing = 8 * max(1, 4 // itemsize)          # 8 rows f32, 16 bf16, 32 int8/fp8
    # Live double-buffered blocks per step: 2*x + 2*out (x dtype) + 2*pe (f32).
    bytes_per_row = width * (4 * itemsize + 2 * 4)
    budget = 8 * 1024 * 1024                     # well under v5e 16 MiB scoped default
    tr = (budget // bytes_per_row) // packing * packing
    tr = max(packing, min(int(tr), 2048))
    # A block equal to the full row extent is always allowed, even if < packing.
    return rows if rows <= tr else tr


def positional_encoding(x: jax.Array, d_model: int) -> jax.Array:
    """x: [batch, seq, d_model] -> [batch, seq, d_model] (eval-mode dropout)."""
    B, S, D = x.shape
    assert D == d_model, "embedding dim must equal d_model for the add to broadcast"

    pe = _pe_table(S, d_model)  # [S, D] f32, cached

    # Lane-dense working layout: fold (S, D) into 128-lane rows when D is not a
    # multiple of 128. Pure elementwise add, so any identical reshape of the
    # batch-0 slab and the PE table is valid. Contiguous reshape = layout no-op.
    if D % 128 == 0:
        rows, width = S, D
    elif (S * D) % 128 == 0:
        rows, width = (S * D) // 128, 128
    else:
        rows, width = S, D  # fallback: still correct, stores are lane-masked

    x_work = x.reshape(B, rows, width)
    pe_work = pe.reshape(rows, width)

    tr = _choose_rows_tile(rows, width, x.dtype.itemsize)
    grid = (pl.cdiv(rows, tr),)

    out = pl.pallas_call(
        _pe_add_kernel,
        out_shape=jax.ShapeDtypeStruct((B, rows, width), x.dtype),
        grid_spec=pltpu.PrefetchScalarGridSpec(
            num_scalar_prefetch=0,
            grid=grid,
            in_specs=[
                # x: only batch 0 is ever read (matches pe[0]-only semantics).
                pl.BlockSpec((pl.Squeezed(), tr, width), lambda r: (0, r, 0)),
                # PE table: one fetch per row-tile, no batch re-fetch.
                pl.BlockSpec((tr, width), lambda r: (r, 0)),
            ],
            out_specs=pl.BlockSpec((pl.Squeezed(), tr, width), lambda r: (0, r, 0)),
        ),
        # Output aliases x: batches 1..B-1 are never touched by the grid and
        # pass through the aliased buffer with zero extra HBM traffic.
        input_output_aliases={0: 0},
        compiler_params=pltpu.CompilerParams(
            dimension_semantics=("parallel",),
        ),
    )(x_work, pe_work)

    return out.reshape(B, S, D)


def _reference(x: jax.Array, d_model: int) -> jax.Array:
    # Plain-JAX reference mirroring the PyTorch forward (eval-mode dropout).
    B, S, D = x.shape
    position = jnp.arange(S, dtype=jnp.float32)[:, None]
    div_term = jnp.exp(
        jnp.arange(0, d_model, 2, dtype=jnp.float32) * (-math.log(10000.0) / d_model)
    )
    pe = jnp.zeros((B, S, d_model), dtype=jnp.float32)
    pe = pe.at[0, :, 0::2].set(jnp.sin(position * div_term))
    pe = pe.at[0, :, 1::2].set(jnp.cos(position * div_term))
    return (x.astype(jnp.float32) + pe).astype(x.dtype)


if __name__ == "__main__":
    B, S, D_MODEL = 2, 8, 32
    key = jax.random.PRNGKey(0)
    x = jax.random.normal(key, (B, S, D_MODEL), dtype=jnp.float32)

    ref = _reference(x, D_MODEL)            # computed before the aliased call

    out = positional_encoding(x, D_MODEL)
    out = jax.block_until_ready(out)

    assert out.shape == (B, S, D_MODEL)
    assert jnp.allclose(out, ref, atol=1e-5, rtol=1e-5), "mismatch vs reference"

    print("KERNEL_OK")
</pallas_src>

<mosaic_0001>
module attributes {stable_mosaic.version = 11 : i64} {
  func.func @_pe_add_kernel(%arg0: i32, %arg1: memref<1x2x128xf32, #tpu.memory_space<vmem>>, %arg2: memref<2x128xf32, #tpu.memory_space<vmem>>, %arg3: memref<1x2x128xf32, #tpu.memory_space<vmem>>) attributes {dimension_semantics = [#tpu.dimension_semantics<parallel>], iteration_bounds = array<i64: 1>, scalar_prefetch = 0 : i64, scratch_operands = 0 : i64, tpu.core_type = #tpu.core_type<tc>, window_params = [{transform_indices = @transform_0, window_bounds = array<i64: 1, 2, 128>}, {transform_indices = @transform_1, window_bounds = array<i64: 2, 128>}, {transform_indices = @transform_2, window_bounds = array<i64: 1, 2, 128>}]} {
    %c0 = arith.constant 0 : index
    %c0_0 = arith.constant 0 : index
    %c0_1 = arith.constant 0 : index
    %0 = vector.load %arg1[%c0, %c0_0, %c0_1] : memref<1x2x128xf32, #tpu.memory_space<vmem>>, vector<1x2x128xf32>
    %1 = vector.shape_cast %0 : vector<1x2x128xf32> to vector<2x128xf32>
    %c0_2 = arith.constant 0 : index
    %c0_3 = arith.constant 0 : index
    %2 = vector.load %arg2[%c0_2, %c0_3] : memref<2x128xf32, #tpu.memory_space<vmem>>, vector<2x128xf32>
    %3 = arith.addf %1, %2 : vector<2x128xf32>
    %c0_4 = arith.constant 0 : index
    %c0_5 = arith.constant 0 : index
    %c0_6 = arith.constant 0 : index
    %4 = vector.load %arg3[%c0_4, %c0_5, %c0_6] : memref<1x2x128xf32, #tpu.memory_space<vmem>>, vector<1x2x128xf32>
    %5 = vector.shape_cast %4 : vector<1x2x128xf32> to vector<2x128xf32>
    %6 = vector.shape_cast %3 : vector<2x128xf32> to vector<1x2x128xf32>
    tpu.vector_store %arg3[%c0_4, %c0_5, %c0_6], %6 {strides = array<i32>} : memref<1x2x128xf32, #tpu.memory_space<vmem>>, vector<1x2x128xf32>,
    return
  }
  func.func @transform_0(%arg0: i32) -> (i32, i32, i32) {
    %c0_i32 = arith.constant 0 : i32
    %c0_i32_0 = arith.constant 0 : i32
    %c0_i32_1 = arith.constant 0 : i32
    return %c0_i32, %arg0, %c0_i32_0 : i32, i32, i32
  }
  func.func @transform_1(%arg0: i32) -> (i32, i32) {
    %c0_i32 = arith.constant 0 : i32
    %c0_i32_0 = arith.constant 0 : i32
    return %arg0, %c0_i32 : i32, i32
  }
  func.func @transform_2(%arg0: i32) -> (i32, i32, i32) {
    %c0_i32 = arith.constant 0 : i32
    %c0_i32_0 = arith.constant 0 : i32
    %c0_i32_1 = arith.constant 0 : i32
    return %c0_i32, %arg0, %c0_i32_0 : i32, i32, i32
  }
}

</mosaic_0001>

<bundles_post_ra>
// kernel: tpu_custom_call.1
= control target key start
LH: loop header
LB: loop body
LE: loop exit
PB: predicated region body
PF: predicated region fallthrough
CT: control target
= control target key end

     0   :  { %7 = vsyncpa [#allocation3], 0  ;;  %s143_s0 = inlined_call_operand.hbm [shape: f32[2,2,128], index: 0, kind: input, shape index: {}, may-alias: {0,2}]   ;;  %s144_s1 = inlined_call_operand.vmem [shape: f32[2,128], index: 1, kind: input, shape index: {}]   ;;  %s145_s2 = inlined_call_operand.hbm [shape: f32[2,2,128], index: 2, kind: output, shape index: {}, may-alias: {0,2}]  }
   0x1   :  { %8 = vsyncpa [#allocation4], 0  ;;  %s93_s9 = smov [#allocation2]   ;;  %s45_s13 = scalar_lea.hbm %s143_s0, 32 }
   0x2   :  { %s15_s10 = sshll.u32 %s93_s9, 4  ;;  %p46_p0 = scmp.ne.s32.totalorder %s143_s0, %s45_s13  ;;  %s16_s10 = int_to_ptr.vmem [resolvable:$true] %s15_s10 }
   0x3   :  { %s47_s18 = scalar_lea.hbm %s143_s0, 64  ;;  %p49_p2 = scmp.lt.u32.totalorder %s45_s13, %s143_s0 }
   0x4   :  { %p48_p1 = scmp.lt.u32.totalorder %s47_s18, %s45_s13 }
   0x6   :  { %p50_p3 = por %p49_p2, %p48_p1 }
   0x8   :  { %p51_p4 = pnand %p50_p3, %p46_p0 }
   0xa   :  { %54 = shalt.err (!%p51_p4)
}
   0xb   :  { %s55_s21 = scalar_lea.vmem %s16_s10, 32  ;;  %p60_p6 = scmp.lt.s32.totalorder %s16_s10, %s16_s10 }
   0xc   :  { %p56_p5 = scmp.ne.s32.totalorder %s16_s10, %s55_s21  ;;  %p61_p7 = scmp.lt.s32.totalorder %s55_s21, %s55_s21 }
   0xe   :  { %p62_p8 = por %p61_p7, %p60_p6 }
  0x10   :  { %p63_p9 = pnand %p62_p8, %p56_p5 }
  0x12   :  { %66 = shalt.err (!%p63_p9)
}
  0x13   :  { %18 = dma.hbm_to_vmem [thread:$0]  %s143_s0, 32, %s16_s10, [#allocation3]  }
  0x14   :  { %89 = dma.done.wait [#allocation3], 32  }
  0x15   :  { %90 = vsyncadd [#allocation3], 4294967264  ;;  %s94_s24 = smov [#allocation5]   ;;  %v24_v0 = vld [vmem:[#allocation2] sm:$0x3] }
  0x16   :  { %s34_s25 = sshll.u32 %s94_s24, 4  ;;  %v25_v1 = vld [vmem:[%s144_s1] sm:$0x3]  ;;  %s35_s25 = int_to_ptr.vmem [resolvable:$true] %s34_s25 }
  0x17   :  { %v26_v2 = vadd.f32 %v25_v1, %v24_v0  ;;  %s67_s28 = scalar_lea.vmem %s35_s25, 32  ;;  %p72_p11 = scmp.lt.s32.totalorder %s35_s25, %s35_s25 }
  0x18   :  { %p68_p10 = scmp.ne.s32.totalorder %s35_s25, %s67_s28  ;;  %p73_p12 = scmp.lt.s32.totalorder %s67_s28, %s67_s28 }
  0x19   :  { %27 = vst [vmem:[#allocation5] sm:$0x3] %v26_v2 }
  0x1a   :  { %p74_p13 = por %p73_p12, %p72_p11 }
  0x1c   :  { %p75_p0 = pnand %p74_p13, %p68_p10 }
  0x1e   :  { %78 = shalt.err (!%p75_p0)
}
  0x1f   :  { %s79_s30 = scalar_lea.hbm %s145_s2, 32  ;;  %s81_s6 = scalar_lea.hbm %s145_s2, 64 }
  0x20   :  { %p80_p1 = scmp.ne.s32.totalorder %s145_s2, %s79_s30  ;;  %p82_p2 = scmp.lt.u32.totalorder %s81_s6, %s79_s30 }
  0x21   :  { %p83_p3 = scmp.lt.u32.totalorder %s79_s30, %s145_s2 }
  0x23   :  { %p84_p4 = por %p83_p3, %p82_p2 }
  0x25   :  { %p85_p5 = pnand %p84_p4, %p80_p1 }
  0x27   :  { %88 = shalt.err (!%p85_p5)
}
  0x28   :  { %37 = dma.vmem_to_hbm [thread:$0]  %s35_s25, 32, %s145_s2, [#allocation4]  }
  0x29   :  { %91 = dma.done.wait [#allocation4], 32  }
  0x2a   :  { %92 = vsyncadd [#allocation4], 4294967264 }
  0x2b   :  { %41 = vsyncpa [#allocation3], 1 }
  0x2c   :  { %42 = vsyncpa [#allocation4], 1 }

</bundles_post_ra>
